<compile_context>
chip_gen: v7x
topology: tpu7x:2x2x1
jax: 0.10.0
libtpu: 0.0.40
codegen_flags: <defaults>
</compile_context>

<pallas_src>
import jax
import jax.numpy as jnp
from jax.experimental import pallas as pl
from jax.experimental.pallas import tpu as pltpu

# ----------------------------- model config ---------------------------------
B           = 2       # batch
NUM_FRAMES  = 4       # == in_chans of the timm backbone
NUM_CLASSES = 8
H = W       = 16      # spatial
CIN         = NUM_FRAMES
CHID        = 32      # hidden conv channels of the synthetic backbone
OUT         = NUM_CLASSES * NUM_FRAMES   # timm head width = 32
OUT_PAD     = 128                        # lane-dense padded head width
HW          = H * W                      # 256
KP          = 9 * CIN                    # 36  -> im2col contraction depth
KPA         = KP + 1                     # 37  -> +1 constant column (conv bias)
M_ROWS      = B * HW                     # 512 -> fused-batch matmul M


# ------------------------------- kernel -------------------------------------
def action_kernel(patch_ref, wc_ref, wh_ref, out_ref):
    # patch_ref: (B*HW, KPA)     im2col patches for BOTH batch elements,
    #                            last column is a constant 1 (bias column)
    # wc_ref:    (KPA, CHID)     compact 3x3 conv weights, last row = conv bias
    # wh_ref:    (CHID, OUT_PAD) (avg-pool-scale ∘ linear head), zero-padded
    # out_ref:   (B, OUT_PAD)    lane-dense logits (head bias added outside)
    hidden = jnp.dot(patch_ref[...], wc_ref[...],
                     preferred_element_type=jnp.float32)           # (B*HW, CHID)
    hidden = jnp.maximum(hidden, 0.0)                              # ReLU (bias folded)
    # Reduce-first epilogue: per-batch sublane sum, then a tiny matmul.
    feat = jnp.sum(hidden.reshape(B, HW, CHID), axis=1)            # (B, CHID)
    out_ref[...] = jnp.dot(feat, wh_ref[...],
                           preferred_element_type=jnp.float32)     # (B, OUT_PAD)


# --------------------------- parameter packing -------------------------------
def prepare_params(conv_w_hwio, conv_b, head_w):
    """Called ONCE (hoisted out of the forward path)."""
    # conv_w_hwio: (3, 3, CIN, CHID) -> (9*CIN, CHID); flattening order
    # (ky, kx, cin) matches the im2col patch layout built in the wrapper.
    wc = conv_w_hwio.reshape(KP, CHID).astype(jnp.float32)
    # Fold the conv bias in as an extra contraction row (pairs with the
    # constant-1 patch column).
    wc_aug = jnp.concatenate(
        [wc, conv_b.reshape(1, CHID).astype(jnp.float32)], axis=0)  # (KPA, CHID)
    # Fold the 1/(H*W) global-average-pool scale into the head weights and
    # zero-pad the head to a lane-dense 128-wide output.
    wh = head_w.astype(jnp.float32) / float(HW)
    wh_pad = jnp.pad(wh, ((0, 0), (0, OUT_PAD - OUT)))               # (CHID, OUT_PAD)
    return wc_aug, wh_pad


# ------------------------------- forward -------------------------------------
def action_timm_forward(x_nchw, wc_aug, wh_pad, head_b):
    """x_nchw: (B, NUM_FRAMES, H, W) f32 -> (B, NUM_FRAMES, NUM_CLASSES)."""
    # ---- glue: NCHW -> NHWC, pad=1, im2col with static aligned slices ----
    x = jnp.transpose(x_nchw, (0, 2, 3, 1))                          # (B, H, W, CIN)
    xp = jnp.pad(x, ((0, 0), (1, 1), (1, 1), (0, 0)))                # (B, H+2, W+2, CIN)
    cols = [xp[:, ky:ky + H, kx:kx + W, :]                           # (B, H, W, CIN)
            for ky in range(3) for kx in range(3)]
    cols.append(jnp.ones((B, H, W, 1), jnp.float32))                 # bias column
    patches = jnp.concatenate(cols, axis=-1).reshape(M_ROWS, KPA)    # (B*HW, 37)

    flops = 2 * (M_ROWS * KPA * CHID + B * CHID * OUT_PAD)
    bytes_accessed = 4 * (M_ROWS * KPA + KPA * CHID + CHID * OUT_PAD + B * OUT_PAD)

    # ---- hot path: single-step Pallas kernel (both batch elements fused) ----
    out = pl.pallas_call(
        action_kernel,
        out_shape=jax.ShapeDtypeStruct((B, OUT_PAD), jnp.float32),
        grid=(1,),
        in_specs=[
            pl.BlockSpec((M_ROWS, KPA), lambda i: (0, 0)),
            pl.BlockSpec((KPA, CHID), lambda i: (0, 0)),
            pl.BlockSpec((CHID, OUT_PAD), lambda i: (0, 0)),
        ],
        out_specs=pl.BlockSpec((B, OUT_PAD), lambda i: (0, 0)),
        cost_estimate=pl.CostEstimate(
            flops=flops, transcendentals=0, bytes_accessed=bytes_accessed),
    )(patches, wc_aug, wh_pad)

    # Head bias + ActionTimm.forward reshape: (B, OUT) -> (B, T, C).
    logits = out[:, :OUT] + head_b
    return logits.reshape(B, NUM_FRAMES, NUM_CLASSES)


# ------------------------------ reference -----------------------------------
def reference_forward(x_nchw, conv_w_hwio, conv_b, head_w, head_b):
    x = jnp.transpose(x_nchw, (0, 2, 3, 1))
    y = jax.lax.conv_general_dilated(
        x, conv_w_hwio, window_strides=(1, 1), padding='SAME',
        dimension_numbers=('NHWC', 'HWIO', 'NHWC'))
    y = jax.nn.relu(y + conv_b)
    feat = jnp.mean(y, axis=(1, 2))                     # global average pool
    logits = feat @ head_w + head_b                     # (B, OUT)
    return logits.reshape(B, NUM_FRAMES, NUM_CLASSES)


# -------------------------------- main ---------------------------------------
if __name__ == "__main__":
    key = jax.random.PRNGKey(0)
    k_x, k_cw, k_cb, k_hw, k_hb = jax.random.split(key, 5)

    x = jax.random.normal(k_x, (B, NUM_FRAMES, H, W), dtype=jnp.float32)
    conv_w = jax.random.normal(k_cw, (3, 3, CIN, CHID), dtype=jnp.float32) * 0.1
    conv_b = jax.random.normal(k_cb, (CHID,), dtype=jnp.float32) * 0.1
    head_w = jax.random.normal(k_hw, (CHID, OUT), dtype=jnp.float32) * 0.1
    head_b = jax.random.normal(k_hb, (OUT,), dtype=jnp.float32) * 0.1

    # Parameter repack happens exactly once (hoisted out of the forward path).
    packed = jax.block_until_ready(prepare_params(conv_w, conv_b, head_w))

    forward = jax.jit(action_timm_forward)
    out = jax.block_until_ready(forward(x, *packed, head_b))

    ref = jax.block_until_ready(
        reference_forward(x, conv_w, conv_b, head_w, head_b))

    assert out.shape == (B, NUM_FRAMES, NUM_CLASSES), out.shape
    assert jnp.allclose(out, ref, rtol=1e-4, atol=1e-4), (
        float(jnp.max(jnp.abs(out - ref))))
    print("KERNEL_OK")
</pallas_src>

<mosaic_0001>
module attributes {stable_mosaic.version = 11 : i64} {
  func.func @action_kernel(%arg0: i32, %arg1: memref<512x37xf32, #tpu.memory_space<vmem>>, %arg2: memref<37x32xf32, #tpu.memory_space<vmem>>, %arg3: memref<32x128xf32, #tpu.memory_space<vmem>>, %arg4: memref<2x128xf32, #tpu.memory_space<vmem>>) attributes {dimension_semantics = [#tpu.dimension_semantics<arbitrary>], iteration_bounds = array<i64: 1>, scalar_prefetch = 0 : i64, scratch_operands = 0 : i64, tpu.core_type = #tpu.core_type<tc>, window_params = [{pipeline_mode = #tpu.pipeline_mode<synchronous>, transform_indices = @transform_0, window_bounds = array<i64: 512, 37>}, {pipeline_mode = #tpu.pipeline_mode<synchronous>, transform_indices = @transform_1, window_bounds = array<i64: 37, 32>}, {pipeline_mode = #tpu.pipeline_mode<synchronous>, transform_indices = @transform_2, window_bounds = array<i64: 32, 128>}, {pipeline_mode = #tpu.pipeline_mode<synchronous>, transform_indices = @transform_3, window_bounds = array<i64: 2, 128>}]} {
    %c0 = arith.constant 0 : index
    %c0_0 = arith.constant 0 : index
    %0 = vector.load %arg1[%c0, %c0_0] : memref<512x37xf32, #tpu.memory_space<vmem>>, vector<512x37xf32>
    %c0_1 = arith.constant 0 : index
    %c0_2 = arith.constant 0 : index
    %1 = vector.load %arg2[%c0_1, %c0_2] : memref<37x32xf32, #tpu.memory_space<vmem>>, vector<37x32xf32>
    %cst = arith.constant dense<0.000000e+00> : vector<512x32xf32>
    %2 = tpu.matmul %0, %1, %cst {dimension_numbers = #tpu.dot_dimension_numbers<[1], [0], [0], [1], [0, 0, 1, 1], [], []>} : vector<512x37xf32>, vector<37x32xf32>, vector<512x32xf32> -> vector<512x32xf32>
    %cst_3 = arith.constant 0.000000e+00 : f32
    %3 = vector.broadcast %cst_3 : f32 to vector<512x32xf32>
    %4 = arith.maximumf %2, %3 : vector<512x32xf32>
    %5 = vector.shape_cast %4 : vector<512x32xf32> to vector<2x256x32xf32>
    %cst_4 = arith.constant dense<0.000000e+00> : vector<2x32xf32>
    %6 = vector.multi_reduction <add>, %5, %cst_4 [1] : vector<2x256x32xf32> to vector<2x32xf32>
    %c0_5 = arith.constant 0 : index
    %c0_6 = arith.constant 0 : index
    %7 = vector.load %arg3[%c0_5, %c0_6] : memref<32x128xf32, #tpu.memory_space<vmem>>, vector<32x128xf32>
    %cst_7 = arith.constant dense<0.000000e+00> : vector<2x128xf32>
    %8 = tpu.matmul %6, %7, %cst_7 {dimension_numbers = #tpu.dot_dimension_numbers<[1], [0], [0], [1], [0, 0, 1, 1], [], []>} : vector<2x32xf32>, vector<32x128xf32>, vector<2x128xf32> -> vector<2x128xf32>
    %c0_8 = arith.constant 0 : index
    %c0_9 = arith.constant 0 : index
    %9 = vector.load %arg4[%c0_8, %c0_9] : memref<2x128xf32, #tpu.memory_space<vmem>>, vector<2x128xf32>
    tpu.vector_store %arg4[%c0_8, %c0_9], %8 {strides = array<i32>} : memref<2x128xf32, #tpu.memory_space<vmem>>, vector<2x128xf32>,
    return
  }
  func.func @transform_0(%arg0: i32) -> (i32, i32) {
    %c0_i32 = arith.constant 0 : i32
    %c0_i32_0 = arith.constant 0 : i32
    %c0_i32_1 = arith.constant 0 : i32
    return %c0_i32, %c0_i32_0 : i32, i32
  }
  func.func @transform_1(%arg0: i32) -> (i32, i32) {
    %c0_i32 = arith.constant 0 : i32
    %c0_i32_0 = arith.constant 0 : i32
    %c0_i32_1 = arith.constant 0 : i32
    return %c0_i32, %c0_i32_0 : i32, i32
  }
  func.func @transform_2(%arg0: i32) -> (i32, i32) {
    %c0_i32 = arith.constant 0 : i32
    %c0_i32_0 = arith.constant 0 : i32
    %c0_i32_1 = arith.constant 0 : i32
    return %c0_i32, %c0_i32_0 : i32, i32
  }
  func.func @transform_3(%arg0: i32) -> (i32, i32) {
    %c0_i32 = arith.constant 0 : i32
    %c0_i32_0 = arith.constant 0 : i32
    %c0_i32_1 = arith.constant 0 : i32
    return %c0_i32, %c0_i32_0 : i32, i32
  }
}

</mosaic_0001>

<bundles_post_ra>
// kernel: action_timm_forward.1
= control target key start
LH: loop header
LB: loop body
LE: loop exit
PB: predicated region body
PF: predicated region fallthrough
CT: control target
= control target key end

     0   :  { %vm83_vm0 = vcmask 302080   ;;  %vm276_vm1 = vcmask 1044480   ;;  %vm729_vm2 = vcmask 261120   ;;  %vm1234_vm3 = vmmov 0   ;;  %s1701_s1 = inlined_call_operand.vmem [shape: f32[37,32], index: 1, kind: input, shape index: {}]   ;;  %s1702_s0 = inlined_call_operand.vmem [shape: f32[512,37], index: 0, kind: input, shape index: {}]   ;;  %s1703_s2 = inlined_call_operand.vmem [shape: f32[32,128], index: 2, kind: input, shape index: {}]   ;;  %s1704_s3 = inlined_call_operand.vmem [shape: f32[2,128], index: 3, kind: output, shape index: {}]  }
   0x1   :  { %v78_v0 = vld [vmem:[%s1701_s1] sm:$0xff]  ;;  %v79_v1 = vld [vmem:[%s1701_s1 + $0x8] sm:$0xff]  ;;  %v80_v2 = vld [vmem:[%s1701_s1 + $0x10] sm:$0xff]  ;;  %vm874_vm4 = vcmask 1041409  }
   0x2   :  { %v1210_v3 = vpack.c.bf16 %v79_v1, %v78_v0  ;;  %v81_v4 = vld [vmem:[%s1701_s1 + $0x18] sm:$0xff]  ;;  %v14_v5 = vld [vmem:[%s1702_s0] sm:$0xff]  ;;  %v15_v8 = vld [vmem:[%s1702_s0 + $0x8] sm:$0xff] }
   0x3   :  { %v1214_v6 = vpack.c.bf16 %v81_v4, %v80_v2  ;;  %1103 = vmatprep.mubr.msk.f32.mxu0 %vm83_vm0, %v14_v5  ;;  %v82_v7 = vld [vmem:[%s1701_s1 + $0x20] sm:$0x1f]  ;;  %v16_v9 = vld [vmem:[%s1702_s0 + $0x10] sm:$0xff]  ;;  %v49_v11 = vld [vmem:[%s1702_s0 + $0x118] sm:$0xff] }
   0x4   :  { %1211 = vmatprep.subr.bf16.mxu0 %v1210_v3  ;;  %1224 = vmatprep.subr.bf16.mxu1 %v1210_v3  ;;  %v48_v10 = vld [vmem:[%s1702_s0 + $0x110] sm:$0xff]  ;;  %v50_v12 = vld [vmem:[%s1702_s0 + $0x120] sm:$0xff]  ;;  %v17_v13 = vld [vmem:[%s1702_s0 + $0x18] sm:$0xff] }
   0x5   :  { %1213 = vmatpush3.bf16.msra.mxu0 %v1210_v3  ;;  %1227 = vmatpush3.bf16.msra.mxu1 %v1210_v3  ;;  %v18_v14 = vld [vmem:[%s1702_s0 + $0x20] sm:$0xff]  ;;  %v51_v15 = vld [vmem:[%s1702_s0 + $0x128] sm:$0xff]  ;;  %v52_v16 = vld [vmem:[%s1702_s0 + $0x130] sm:$0xff] }
   0x6   :  { %1215 = vmatprep.subr.bf16.mxu0 %v1214_v6  ;;  %1225 = vmatprep.subr.bf16.mxu1 %v1214_v6  ;;  %v19_v17 = vld [vmem:[%s1702_s0 + $0x28] sm:$0xff]  ;;  %v20_v18 = vld [vmem:[%s1702_s0 + $0x30] sm:$0xff]  ;;  %v53_v19 = vld [vmem:[%s1702_s0 + $0x138] sm:$0xff] }
   0x7   :  { %1154 = vmatprep.mubr.msk.f32.mxu1 %vm83_vm0, %v48_v10  ;;  %v54_v20 = vld [vmem:[%s1702_s0 + $0x140] sm:$0xff]  ;;  %v21_v21 = vld [vmem:[%s1702_s0 + $0x38] sm:$0xff]  ;;  %v55_v23 = vld [vmem:[%s1702_s0 + $0x148] sm:$0xff] }
   0x8   :  { %v22_v22 = vld [vmem:[%s1702_s0 + $0x40] sm:$0xff]  ;;  %v56_v24 = vld [vmem:[%s1702_s0 + $0x150] sm:$0xff]  ;;  %v23_v25 = vld [vmem:[%s1702_s0 + $0x48] sm:$0xff] }
   0x9   :  { %1217 = vmatpush3.bf16.msra.mxu0 %v1214_v6  ;;  %1228 = vmatpush3.bf16.msra.mxu1 %v1214_v6  ;;  %v24_v26 = vld [vmem:[%s1702_s0 + $0x50] sm:$0xff]  ;;  %v57_v27 = vld [vmem:[%s1702_s0 + $0x158] sm:$0xff]  ;;  %v58_v28 = vld [vmem:[%s1702_s0 + $0x160] sm:$0xff] }
   0xa   :  { %1101 = vmatprep.subr.msk.mxu0 %vm276_vm1, %v82_v7  ;;  %1226 = vmatprep.subr.msk.mxu1 %vm276_vm1, %v82_v7  ;;  %v25_v29 = vld [vmem:[%s1702_s0 + $0x58] sm:$0xff]  ;;  %v26_v30 = vld [vmem:[%s1702_s0 + $0x60] sm:$0xff]  ;;  %v59_v31 = vld [vmem:[%s1702_s0 + $0x168] sm:$0xff] }
   0xb   :  { %v60_v32 = vld [vmem:[%s1702_s0 + $0x170] sm:$0xff]  ;;  %v27_v33 = vld [vmem:[%s1702_s0 + $0x68] sm:$0xff]  ;;  %v61_v35 = vld [vmem:[%s1702_s0 + $0x178] sm:$0xff] }
   0xc   :  { %v28_v34 = vld [vmem:[%s1702_s0 + $0x70] sm:$0xff]  ;;  %v62_v36 = vld [vmem:[%s1702_s0 + $0x180] sm:$0xff]  ;;  %v29_v37 = vld [vmem:[%s1702_s0 + $0x78] sm:$0xff] }
   0xd   :  { %1102 = vmatpush3.msk.msra.mxu0 %vm276_vm1, %v82_v7  ;;  %1229 = vmatpush3.msk.msra.mxu1 %vm276_vm1, %v82_v7  ;;  %v30_v38 = vld [vmem:[%s1702_s0 + $0x80] sm:$0xff]  ;;  %v63_v39 = vld [vmem:[%s1702_s0 + $0x188] sm:$0xff]  ;;  %v64_v40 = vld [vmem:[%s1702_s0 + $0x190] sm:$0xff]  ;;  %v1233_v7 = vmov 0.0|0.0  }
   0xe   :  { %1104 = vmatmul.mubr.msk.f32.vlgmr.msra.gmra.mrb[0].mxu0 %vm83_vm0, %v15_v8  ;;  %1155 = vmatmul.mubr.msk.f32.vlgmr.msra.gmra.mrb[0].mxu1 %vm83_vm0, %v49_v11  ;;  %v31_v41 = vld [vmem:[%s1702_s0 + $0x88] sm:$0xff]  ;;  %v32_v42 = vld [vmem:[%s1702_s0 + $0x90] sm:$0xff]  ;;  %v65_v43 = vld [vmem:[%s1702_s0 + $0x198] sm:$0xff] }
   0xf   :  { %1106 = vmatprep.mubr.msk.f32.mxu0 %vm83_vm0, %v16_v9  ;;  %1157 = vmatprep.mubr.msk.f32.mxu1 %vm83_vm0, %v50_v12  ;;  %v66_v44 = vld [vmem:[%s1702_s0 + $0x1a0] sm:$0xff]  ;;  %v33_v45 = vld [vmem:[%s1702_s0 + $0x98] sm:$0xff]  ;;  %v67_v47 = vld [vmem:[%s1702_s0 + $0x1a8] sm:$0xff] }
  0x10   :  { %v34_v46 = vld [vmem:[%s1702_s0 + $0xa0] sm:$0xff]  ;;  %v68_v48 = vld [vmem:[%s1702_s0 + $0x1b0] sm:$0xff]  ;;  %v35_v49 = vld [vmem:[%s1702_s0 + $0xa8] sm:$0xff]  ;;  %1218 = vmatprep.subr.bf16.mxu1 %v1233_v7 }
  0x11   :  { %v36_v50 = vld [vmem:[%s1702_s0 + $0xb0] sm:$0xff]  ;;  %v69_v51 = vld [vmem:[%s1702_s0 + $0x1b8] sm:$0xff]  ;;  %v70_v52 = vld [vmem:[%s1702_s0 + $0x1c0] sm:$0xff] }
  0x12   :  { %1107 = vmatmul.mubr.msk.f32.gmra.mrb[2].mxu0 %vm83_vm0, %v17_v13  ;;  %1158 = vmatmul.mubr.msk.f32.gmra.mrb[2].mxu1 %vm83_vm0, %v51_v15  ;;  %v37_v53 = vld [vmem:[%s1702_s0 + $0xb8] sm:$0xff]  ;;  %v38_v54 = vld [vmem:[%s1702_s0 + $0xc0] sm:$0xff]  ;;  %v71_v55 = vld [vmem:[%s1702_s0 + $0x1c8] sm:$0xff] }
  0x13   :  { %1109 = vmatprep.mubr.msk.f32.mxu0 %vm83_vm0, %v18_v14  ;;  %1160 = vmatprep.mubr.msk.f32.mxu1 %vm83_vm0, %v52_v16  ;;  %v72_v56 = vld [vmem:[%s1702_s0 + $0x1d0] sm:$0xff]  ;;  %v39_v57 = vld [vmem:[%s1702_s0 + $0xc8] sm:$0xff]  ;;  %v73_v59 = vld [vmem:[%s1702_s0 + $0x1d8] sm:$0xff] }
  0x14   :  { %v40_v58 = vld [vmem:[%s1702_s0 + $0xd0] sm:$0xff]  ;;  %v74_v60 = vld [vmem:[%s1702_s0 + $0x1e0] sm:$0xff]  ;;  %v41_v61 = vld [vmem:[%s1702_s0 + $0xd8] sm:$0xff] }
  0x15   :  { %v42_v62 = vld [vmem:[%s1702_s0 + $0xe0] sm:$0xff]  ;;  %v75_v63 = vld [vmem:[%s1702_s0 + $0x1e8] sm:$0xff]  ;;  %v76_v0 = vld [vmem:[%s1702_s0 + $0x1f0] sm:$0xff] }
  0x16   :  { %1110 = vmatmul.mubr.msk.f32.gmra.mrb[4].mxu0 %vm83_vm0, %v19_v17  ;;  %1161 = vmatmul.mubr.msk.f32.gmra.mrb[4].mxu1 %vm83_vm0, %v53_v19  ;;  %v43_v1 = vld [vmem:[%s1702_s0 + $0xe8] sm:$0xff]  ;;  %v44_v2 = vld [vmem:[%s1702_s0 + $0xf0] sm:$0xff]  ;;  %v77_v3 = vld [vmem:[%s1702_s0 + $0x1f8] sm:$0xff] }
  0x17   :  { %1112 = vmatprep.mubr.msk.f32.mxu0 %vm83_vm0, %v20_v18  ;;  %1163 = vmatprep.mubr.msk.f32.mxu1 %vm83_vm0, %v54_v20  ;;  %v45_v4 = vld [vmem:[%s1702_s0 + $0xf8] sm:$0xff]  ;;  %v46_v5 = vld [vmem:[%s1702_s0 + $0x100] sm:$0xff]  ;;  %v47_v6 = vld [vmem:[%s1702_s0 + $0x108] sm:$0xff] }
  0x18   :  { %v868_v8 = vld [vmem:[%s1703_s2] sm:$0xff]  ;;  %v869_v9 = vld [vmem:[%s1703_s2 + $0x8] sm:$0xff]  ;;  %v870_v11 = vld [vmem:[%s1703_s2 + $0x10] sm:$0xff] }
  0x19   :  { %v1219_v10 = vpack.c.bf16 %v869_v9, %v868_v8  ;;  %v871_v12 = vld [vmem:[%s1703_s2 + $0x18] sm:$0xff] }
  0x1a   :  { %1113 = vmatmul.mubr.msk.f32.gmra.mrb[6].mxu0 %vm83_vm0, %v21_v21  ;;  %1164 = vmatmul.mubr.msk.f32.gmra.mrb[6].mxu1 %vm83_vm0, %v55_v23  ;;  %v1222_v13 = vpack.c.bf16 %v871_v12, %v870_v11 }
  0x1b   :  { %1115 = vmatprep.mubr.msk.f32.mxu0 %vm83_vm0, %v22_v22  ;;  %1166 = vmatprep.mubr.msk.f32.mxu1 %vm83_vm0, %v56_v24 }
  0x1c   :  { %1220 = vmatpush3.bf16.msra.mxu1 %v1219_v10 }
  0x1d   :  { %1221 = vmatprep.subr.bf16.mxu1 %v1233_v7 }
  0x1e   :  { %1116 = vmatmul.mubr.msk.f32.gmra.mrb[8].mxu0 %vm83_vm0, %v23_v25  ;;  %1167 = vmatmul.mubr.msk.f32.gmra.mrb[8].mxu1 %vm83_vm0, %v57_v27 }
  0x1f   :  { %1118 = vmatprep.mubr.msk.f32.mxu0 %vm83_vm0, %v24_v26  ;;  %1169 = vmatprep.mubr.msk.f32.mxu1 %vm83_vm0, %v58_v28 }
  0x20   :  { %1223 = vmatpush3.bf16.msra.mxu1 %v1222_v13 }
  0x22   :  { %1119 = vmatmul.mubr.msk.f32.gmra.mrb[10].mxu0 %vm83_vm0, %v25_v29  ;;  %1170 = vmatmul.mubr.msk.f32.gmra.mrb[10].mxu1 %vm83_vm0, %v59_v31 }
  0x23   :  { %1121 = vmatprep.mubr.msk.f32.mxu0 %vm83_vm0, %v26_v30  ;;  %1172 = vmatprep.mubr.msk.f32.mxu1 %vm83_vm0, %v60_v32 }
  0x26   :  { %1122 = vmatmul.mubr.msk.f32.gmra.mrb[12].mxu0 %vm83_vm0, %v27_v33  ;;  %1173 = vmatmul.mubr.msk.f32.gmra.mrb[12].mxu1 %vm83_vm0, %v61_v35 }
  0x27   :  { %1124 = vmatprep.mubr.msk.f32.mxu0 %vm83_vm0, %v28_v34  ;;  %1175 = vmatprep.mubr.msk.f32.mxu1 %vm83_vm0, %v62_v36 }
  0x2a   :  { %1125 = vmatmul.mubr.msk.f32.gmra.mrb[14].mxu0 %vm83_vm0, %v29_v37  ;;  %1176 = vmatmul.mubr.msk.f32.gmra.mrb[14].mxu1 %vm83_vm0, %v63_v39 }
  0x2b   :  { %1127 = vmatprep.mubr.msk.f32.mxu0 %vm83_vm0, %v30_v38  ;;  %1178 = vmatprep.mubr.msk.f32.mxu1 %vm83_vm0, %v64_v40 }
  0x2e   :  { %1128 = vmatmul.mubr.msk.f32.gmra.mrb[16].mxu0 %vm83_vm0, %v31_v41  ;;  %1179 = vmatmul.mubr.msk.f32.gmra.mrb[16].mxu1 %vm83_vm0, %v65_v43 }
  0x2f   :  { %1130 = vmatprep.mubr.msk.f32.mxu0 %vm83_vm0, %v32_v42  ;;  %1181 = vmatprep.mubr.msk.f32.mxu1 %vm83_vm0, %v66_v44 }
  0x32   :  { %1131 = vmatmul.mubr.msk.f32.gmra.mrb[18].mxu0 %vm83_vm0, %v33_v45  ;;  %1182 = vmatmul.mubr.msk.f32.gmra.mrb[18].mxu1 %vm83_vm0, %v67_v47 }
  0x33   :  { %1133 = vmatprep.mubr.msk.f32.mxu0 %vm83_vm0, %v34_v46  ;;  %1184 = vmatprep.mubr.msk.f32.mxu1 %vm83_vm0, %v68_v48 }
  0x36   :  { %1134 = vmatmul.mubr.msk.f32.gmra.mrb[20].mxu0 %vm83_vm0, %v35_v49  ;;  %1185 = vmatmul.mubr.msk.f32.gmra.mrb[20].mxu1 %vm83_vm0, %v69_v51  ;;  %v1235_v49 = vmov 0.0  }
  0x37   :  { %1136 = vmatprep.mubr.msk.f32.mxu0 %vm83_vm0, %v36_v50  ;;  %1187 = vmatprep.mubr.msk.f32.mxu1 %vm83_vm0, %v70_v52 }
  0x3a   :  { %1137 = vmatmul.mubr.msk.f32.gmra.mrb[22].mxu0 %vm83_vm0, %v37_v53  ;;  %1188 = vmatmul.mubr.msk.f32.gmra.mrb[22].mxu1 %vm83_vm0, %v71_v55 }
  0x3b   :  { %1139 = vmatprep.mubr.msk.f32.mxu0 %vm83_vm0, %v38_v54  ;;  %1190 = vmatprep.mubr.msk.f32.mxu1 %vm83_vm0, %v72_v56 }
  0x3e   :  { %1140 = vmatmul.mubr.msk.f32.gmra.mrb[24].mxu0 %vm83_vm0, %v39_v57  ;;  %1191 = vmatmul.mubr.msk.f32.gmra.mrb[24].mxu1 %vm83_vm0, %v73_v59 }
  0x3f   :  { %1142 = vmatprep.mubr.msk.f32.mxu0 %vm83_vm0, %v40_v58  ;;  %1193 = vmatprep.mubr.msk.f32.mxu1 %vm83_vm0, %v74_v60 }
  0x42   :  { %1143 = vmatmul.mubr.msk.f32.gmra.mrb[26].mxu0 %vm83_vm0, %v41_v61  ;;  %1194 = vmatmul.mubr.msk.f32.gmra.mrb[26].mxu1 %vm83_vm0, %v75_v63 }
  0x43   :  { %1145 = vmatprep.mubr.msk.f32.mxu0 %vm83_vm0, %v42_v62  ;;  %1196 = vmatprep.mubr.msk.f32.mxu1 %vm83_vm0, %v76_v0 }
  0x46   :  { %1146 = vmatmul.mubr.msk.f32.gmra.mrb[28].mxu0 %vm83_vm0, %v43_v1  ;;  %1197 = vmatmul.mubr.msk.f32.gmra.mrb[28].mxu1 %vm83_vm0, %v77_v3 }
  0x47   :  { %1148 = vmatprep.mubr.msk.f32.mxu0 %vm83_vm0, %v44_v2  ;;  %1207 = vmatprep.mubr.msk.f32.mxu1 %vm1234_vm3, %v1235_v49 }
  0x4a   :  { %1149 = vmatmul.mubr.msk.f32.gmra.mrb[30].mxu0 %vm83_vm0, %v45_v4 }
  0x4b   :  { %1151 = vmatprep.mubr.msk.f32.mxu0 %vm83_vm0, %v46_v5 }
  0x4e   :  { %1152 = vmatmul.mubr.msk.f32.gmra.mrb[32].mxu0 %vm83_vm0, %v47_v6 }
  0xe1   :  { %v1105_v14 = vpop.f32.mrb[0].mxu0  ;;  %v1539_v18 = vpop.f32.mrb[0].mxu1 }
  0xe2   :  { %v666_v15 = vmax.f32 %v1105_v14, 0.0  ;;  %v346_v16 = vpop.f32.mrb[1].mxu0  ;;  %v1542_v20 = vpop.f32.mrb[1].mxu1 }
  0xe3   :  { %v665_v17 = vmax.f32 %v346_v16, 0.0 }
  0xe4   :  { %v731_v19 = vsel %vm729_vm2, %v666_v15, 0.0 }
  0xe5   :  { %v730_v21 = vsel %vm729_vm2, %v665_v17, 0.0  ;;  %v1108_v22 = vpop.f32.mrb[2].mxu0  ;;  %v1545_v27 = vpop.f32.mrb[2].mxu1 }
  0xe6   :  { %v732_v23 = vadd.f32 %v731_v19, %v730_v21  ;;  %v356_v24 = vpop.f32.mrb[3].mxu0  ;;  %v668_v25 = vmax.f32 %v1108_v22, 0.0  ;;  %v1547_v28 = vpop.f32.mrb[3].mxu1 }
  0xe7   :  { %v667_v26 = vmax.f32 %v356_v24, 0.0 }
  0xe8   :  { %v735_v33 = vsel %vm729_vm2, %v668_v25, 0.0 }
  0xe9   :  { %v733_v29 = vsel %vm729_vm2, %v667_v26, 0.0  ;;  %v1111_v30 = vpop.f32.mrb[4].mxu0  ;;  %v1551_v36 = vpop.f32.mrb[4].mxu1 }
  0xea   :  { %v734_v31 = vadd.f32 %v733_v29, %v732_v23  ;;  %v366_v32 = vpop.f32.mrb[5].mxu0  ;;  %v670_v34 = vmax.f32 %v1111_v30, 0.0  ;;  %v1553_v38 = vpop.f32.mrb[5].mxu1 }
  0xeb   :  { %v669_v35 = vmax.f32 %v366_v32, 0.0 }
  0xec   :  { %v736_v37 = vadd.f32 %v735_v33, %v734_v31  ;;  %v739_v43 = vsel %vm729_vm2, %v670_v34, 0.0 }
  0xed   :  { %v737_v39 = vsel %vm729_vm2, %v669_v35, 0.0  ;;  %v1114_v40 = vpop.f32.mrb[6].mxu0  ;;  %v1557_v46 = vpop.f32.mrb[6].mxu1 }
  0xee   :  { %v738_v41 = vadd.f32 %v737_v39, %v736_v37  ;;  %v376_v42 = vpop.f32.mrb[7].mxu0  ;;  %v672_v44 = vmax.f32 %v1114_v40, 0.0  ;;  %v1559_v48 = vpop.f32.mrb[7].mxu1 }
  0xef   :  { %v671_v45 = vmax.f32 %v376_v42, 0.0 }
  0xf0   :  { %v740_v47 = vadd.f32 %v739_v43, %v738_v41  ;;  %v743_v54 = vsel %vm729_vm2, %v672_v44, 0.0 }
  0xf1   :  { %v741_v50 = vsel %vm729_vm2, %v671_v45, 0.0  ;;  %v1117_v51 = vpop.f32.mrb[8].mxu0  ;;  %v1563_v57 = vpop.f32.mrb[8].mxu1 }
  0xf2   :  { %v742_v52 = vadd.f32 %v741_v50, %v740_v47  ;;  %v386_v53 = vpop.f32.mrb[9].mxu0  ;;  %v674_v55 = vmax.f32 %v1117_v51, 0.0  ;;  %v1565_v59 = vpop.f32.mrb[9].mxu1 }
  0xf3   :  { %v673_v56 = vmax.f32 %v386_v53, 0.0 }
  0xf4   :  { %v744_v58 = vadd.f32 %v743_v54, %v742_v52  ;;  %v747_v0 = vsel %vm729_vm2, %v674_v55, 0.0 }
  0xf5   :  { %v745_v60 = vsel %vm729_vm2, %v673_v56, 0.0  ;;  %v1120_v61 = vpop.f32.mrb[10].mxu0  ;;  %v1569_v3 = vpop.f32.mrb[10].mxu1 }
  0xf6   :  { %v746_v62 = vadd.f32 %v745_v60, %v744_v58  ;;  %v396_v63 = vpop.f32.mrb[11].mxu0  ;;  %v676_v1 = vmax.f32 %v1120_v61, 0.0  ;;  %v1571_v5 = vpop.f32.mrb[11].mxu1 }
  0xf7   :  { %v675_v2 = vmax.f32 %v396_v63, 0.0 }
  0xf8   :  { %v748_v4 = vadd.f32 %v747_v0, %v746_v62  ;;  %v751_v10 = vsel %vm729_vm2, %v676_v1, 0.0 }
  0xf9   :  { %v749_v6 = vsel %vm729_vm2, %v675_v2, 0.0  ;;  %v1123_v7 = vpop.f32.mrb[12].mxu0  ;;  %v1575_v13 = vpop.f32.mrb[12].mxu1 }
  0xfa   :  { %v750_v8 = vadd.f32 %v749_v6, %v748_v4  ;;  %v406_v9 = vpop.f32.mrb[13].mxu0  ;;  %v678_v11 = vmax.f32 %v1123_v7, 0.0  ;;  %v1577_v15 = vpop.f32.mrb[13].mxu1 }
  0xfb   :  { %v677_v12 = vmax.f32 %v406_v9, 0.0 }
  0xfc   :  { %v752_v14 = vadd.f32 %v751_v10, %v750_v8  ;;  %v755_v22 = vsel %vm729_vm2, %v678_v11, 0.0 }
  0xfd   :  { %v753_v16 = vsel %vm729_vm2, %v677_v12, 0.0  ;;  %v1126_v17 = vpop.f32.mrb[14].mxu0  ;;  %v1581_v25 = vpop.f32.mrb[14].mxu1 }
  0xfe   :  { %v754_v19 = vadd.f32 %v753_v16, %v752_v14  ;;  %v416_v21 = vpop.f32.mrb[15].mxu0  ;;  %v680_v23 = vmax.f32 %v1126_v17, 0.0  ;;  %v1583_v29 = vpop.f32.mrb[15].mxu1 }
  0xff   :  { %v679_v24 = vmax.f32 %v416_v21, 0.0 }
 0x100   :  { %v756_v26 = vadd.f32 %v755_v22, %v754_v19  ;;  %v759_v34 = vsel %vm729_vm2, %v680_v23, 0.0 }
 0x101   :  { %v757_v30 = vsel %vm729_vm2, %v679_v24, 0.0  ;;  %v1129_v31 = vpop.f32.mrb[16].mxu0  ;;  %v1587_v39 = vpop.f32.mrb[16].mxu1 }
 0x102   :  { %v758_v32 = vadd.f32 %v757_v30, %v756_v26  ;;  %v426_v33 = vpop.f32.mrb[17].mxu0  ;;  %v682_v35 = vmax.f32 %v1129_v31, 0.0  ;;  %v1589_v41 = vpop.f32.mrb[17].mxu1 }
 0x103   :  { %v681_v37 = vmax.f32 %v426_v33, 0.0 }
 0x104   :  { %v760_v40 = vadd.f32 %v759_v34, %v758_v32  ;;  %v763_v47 = vsel %vm729_vm2, %v682_v35, 0.0 }
 0x105   :  { %v761_v42 = vsel %vm729_vm2, %v681_v37, 0.0  ;;  %v1132_v43 = vpop.f32.mrb[18].mxu0  ;;  %v1593_v51 = vpop.f32.mrb[18].mxu1 }
 0x106   :  { %v762_v44 = vadd.f32 %v761_v42, %v760_v40  ;;  %v436_v45 = vpop.f32.mrb[19].mxu0  ;;  %v684_v49 = vmax.f32 %v1132_v43, 0.0  ;;  %v1595_v53 = vpop.f32.mrb[19].mxu1 }
 0x107   :  { %v683_v50 = vmax.f32 %v436_v45, 0.0 }
 0x108   :  { %v764_v52 = vadd.f32 %v763_v47, %v762_v44  ;;  %v767_v60 = vsel %vm729_vm2, %v684_v49, 0.0 }
 0x109   :  { %v765_v54 = vsel %vm729_vm2, %v683_v50, 0.0  ;;  %v1135_v55 = vpop.f32.mrb[20].mxu0  ;;  %v1599_v63 = vpop.f32.mrb[20].mxu1 }
 0x10a   :  { %v766_v56 = vadd.f32 %v765_v54, %v764_v52  ;;  %v446_v58 = vpop.f32.mrb[21].mxu0  ;;  %v686_v61 = vmax.f32 %v1135_v55, 0.0  ;;  %v1601_v1 = vpop.f32.mrb[21].mxu1 }
 0x10b   :  { %v685_v62 = vmax.f32 %v446_v58, 0.0 }
 0x10c   :  { %v768_v0 = vadd.f32 %v767_v60, %v766_v56  ;;  %v771_v8 = vsel %vm729_vm2, %v686_v61, 0.0 }
 0x10d   :  { %v769_v2 = vsel %vm729_vm2, %v685_v62, 0.0  ;;  %v1138_v4 = vpop.f32.mrb[22].mxu0  ;;  %v1605_v11 = vpop.f32.mrb[22].mxu1 }
 0x10e   :  { %v770_v6 = vadd.f32 %v769_v2, %v768_v0  ;;  %v456_v7 = vpop.f32.mrb[23].mxu0  ;;  %v688_v9 = vmax.f32 %v1138_v4, 0.0  ;;  %v1607_v14 = vpop.f32.mrb[23].mxu1 }
 0x10f   :  { %v687_v10 = vmax.f32 %v456_v7, 0.0 }
 0x110   :  { %v772_v12 = vadd.f32 %v771_v8, %v770_v6  ;;  %v775_v22 = vsel %vm729_vm2, %v688_v9, 0.0 }
 0x111   :  { %v773_v16 = vsel %vm729_vm2, %v687_v10, 0.0  ;;  %v1141_v17 = vpop.f32.mrb[24].mxu0  ;;  %v1611_v26 = vpop.f32.mrb[24].mxu1 }
 0x112   :  { %v774_v19 = vadd.f32 %v773_v16, %v772_v12  ;;  %v466_v21 = vpop.f32.mrb[25].mxu0  ;;  %v690_v23 = vmax.f32 %v1141_v17, 0.0  ;;  %v1613_v31 = vpop.f32.mrb[25].mxu1  ;;  %v699_v16 = vmax.f32 %v1542_v20, 0.0 }
 0x113   :  { %v689_v24 = vmax.f32 %v466_v21, 0.0 }
 0x114   :  { %v776_v30 = vadd.f32 %v775_v22, %v774_v19  ;;  %v779_v37 = vsel %vm729_vm2, %v690_v23, 0.0 }
 0x115   :  { %v777_v32 = vsel %vm729_vm2, %v689_v24, 0.0  ;;  %v1144_v33 = vpop.f32.mrb[26].mxu0  ;;  %v1617_v43 = vpop.f32.mrb[26].mxu1 }
 0x116   :  { %v778_v34 = vadd.f32 %v777_v32, %v776_v30  ;;  %v476_v35 = vpop.f32.mrb[27].mxu0  ;;  %v692_v40 = vmax.f32 %v1144_v33, 0.0  ;;  %v1619_v45 = vpop.f32.mrb[27].mxu1  ;;  %v700_v33 = vmax.f32 %v1539_v18, 0.0  ;;  %v704_v18 = vmax.f32 %v1551_v36, 0.0 }
 0x117   :  { %v691_v42 = vmax.f32 %v476_v35, 0.0  ;;  %v701_v35 = vmax.f32 %v1547_v28, 0.0  ;;  %v705_v28 = vmax.f32 %v1559_v48, 0.0  ;;  %v708_v36 = vmax.f32 %v1563_v57, 0.0 }
 0x118   :  { %v780_v44 = vadd.f32 %v779_v37, %v778_v34  ;;  %v783_v54 = vsel %vm729_vm2, %v692_v40, 0.0  ;;  %v802_v34 = vsel %vm729_vm2, %v699_v16, 0.0  ;;  %v804_v40 = vsel %vm729_vm2, %v700_v33, 0.0 }
 0x119   :  { %v781_v47 = vsel %vm729_vm2, %v691_v42, 0.0  ;;  %v1147_v49 = vpop.f32.mrb[28].mxu0  ;;  %v1623_v58 = vpop.f32.mrb[28].mxu1  ;;  %v702_v42 = vmax.f32 %v1545_v27, 0.0  ;;  %v706_v27 = vmax.f32 %v1557_v46, 0.0  ;;  %v709_v48 = vmax.f32 %v1571_v5, 0.0 }
 0x11a   :  { %v782_v50 = vadd.f32 %v781_v47, %v780_v44  ;;  %v486_v52 = vpop.f32.mrb[29].mxu0  ;;  %v694_v55 = vmax.f32 %v1147_v49, 0.0  ;;  %v1625_v61 = vpop.f32.mrb[29].mxu1  ;;  %v806_v44 = vsel %vm729_vm2, %v701_v35, 0.0  ;;  %v703_v47 = vmax.f32 %v1553_v38, 0.0 }
 0x11b   :  { %v693_v56 = vmax.f32 %v486_v52, 0.0  ;;  %v808_v52 = vsel %vm729_vm2, %v702_v42, 0.0  ;;  %v707_v38 = vmax.f32 %v1565_v59, 0.0  ;;  %v710_v46 = vmax.f32 %v1569_v3, 0.0 }
 0x11c   :  { %v784_v60 = vadd.f32 %v783_v54, %v782_v50  ;;  %v787_v6 = vsel %vm729_vm2, %v694_v55, 0.0  ;;  %v810_v54 = vsel %vm729_vm2, %v703_v47, 0.0  ;;  %v711_v59 = vmax.f32 %v1577_v15, 0.0 }
 0x11d   :  { %v785_v62 = vsel %vm729_vm2, %v693_v56, 0.0  ;;  %v1150_v0 = vpop.f32.mrb[30].mxu0  ;;  %v712_v57 = vmax.f32 %v1575_v13, 0.0  ;;  %v713_v5 = vmax.f32 %v1583_v29, 0.0  ;;  %v714_v3 = vmax.f32 %v1581_v25, 0.0 }
 0x11e   :  { %v786_v2 = vadd.f32 %v785_v62, %v784_v60  ;;  %v496_v4 = vpop.f32.mrb[31].mxu0  ;;  %v696_v7 = vmax.f32 %v1150_v0, 0.0  ;;  %v812_v60 = vsel %vm729_vm2, %v704_v18, 0.0  ;;  %v814_v62 = vsel %vm729_vm2, %v705_v28, 0.0 }
 0x11f   :  { %v695_v8 = vmax.f32 %v496_v4, 0.0  ;;  %v816_v4 = vsel %vm729_vm2, %v706_v27, 0.0  ;;  %v715_v15 = vmax.f32 %v1589_v41, 0.0  ;;  %v716_v13 = vmax.f32 %v1587_v39, 0.0 }
 0x120   :  { %v788_v9 = vadd.f32 %v787_v6, %v786_v2  ;;  %v791_v22 = vsel %vm729_vm2, %v696_v7, 0.0  ;;  %v818_v6 = vsel %vm729_vm2, %v707_v38, 0.0  ;;  %v717_v29 = vmax.f32 %v1595_v53, 0.0 }
 0x121   :  { %v789_v10 = vsel %vm729_vm2, %v695_v8, 0.0  ;;  %v1153_v12 = vpop.f32.mrb[32].mxu0  ;;  %v834_v35 = vsel %vm729_vm2, %v715_v15, 0.0  ;;  %v718_v25 = vmax.f32 %v1593_v51, 0.0  ;;  %v719_v41 = vmax.f32 %v1601_v1, 0.0 }
 0x122   :  { %v790_v17 = vadd.f32 %v789_v10, %v788_v9  ;;  %v698_v19 = vmax.f32 %v1153_v12, 0.0  ;;  %v506_v21 = vpop.f32.mrb[33].mxu0  ;;  %v820_v9 = vsel %vm729_vm2, %v708_v36, 0.0  ;;  %v822_v10 = vsel %vm729_vm2, %v709_v48, 0.0 }
 0x123   :  { %v697_v23 = vmax.f32 %v506_v21, 0.0  ;;  %v838_v42 = vsel %vm729_vm2, %v717_v29, 0.0  ;;  %v720_v39 = vmax.f32 %v1599_v63, 0.0  ;;  %v721_v53 = vmax.f32 %v1607_v14, 0.0 }
 0x124   :  { %v1632_v24 = vadd.f32 %v791_v22, %v790_v17  ;;  %v800_v30 = vsel %vm729_vm2, %v698_v19, 0.0  ;;  %v824_v17 = vsel %vm729_vm2, %v710_v46, 0.0  ;;  %v826_v19 = vsel %vm729_vm2, %v711_v59, 0.0 }
 0x125   :  { %v799_v32 = vsel %vm729_vm2, %v697_v23, 0.0  ;;  %v828_v23 = vsel %vm729_vm2, %v712_v57, 0.0  ;;  %v722_v51 = vmax.f32 %v1605_v11, 0.0  ;;  %v846_v28 = vsel %vm729_vm2, %v721_v53, 0.0 }
 0x126   :  { %v801_v37 = vadd.f32 %v800_v30, %v799_v32  ;;  %v830_v30 = vsel %vm729_vm2, %v713_v5, 0.0  ;;  %v723_v1 = vmax.f32 %v1613_v31, 0.0  ;;  %v724_v63 = vmax.f32 %v1611_v26, 0.0 }
 0x127   :  { %v725_v14 = vmax.f32 %v1619_v45, 0.0  ;;  %v726_v11 = vmax.f32 %v1617_v43, 0.0  ;;  %v727_v31 = vmax.f32 %v1625_v61, 0.0  ;;  %v728_v48 = vmax.f32 %v1623_v58, 0.0 }
 0x128   :  { %v803_v20 = vadd.f32 %v802_v34, %v801_v37  ;;  %v832_v34 = vsel %vm729_vm2, %v714_v3, 0.0  ;;  %v850_v27 = vsel %vm729_vm2, %v723_v1, 0.0 }
 0x129   :  { %v856_v26 = vsel %vm729_vm2, %v726_v11, 0.0  ;;  %v858_v45 = vsel %vm729_vm2, %v727_v31, 0.0  ;;  %v860_v43 = vsel %vm729_vm2, %v728_v48, 0.0 }
 0x12a   :  { %v805_v49 = vadd.f32 %v804_v40, %v803_v20  ;;  %v836_v40 = vsel %vm729_vm2, %v716_v13, 0.0 }
 0x12c   :  { %v807_v50 = vadd.f32 %v806_v44, %v805_v49  ;;  %v840_v49 = vsel %vm729_vm2, %v718_v25, 0.0 }
 0x12e   :  { %v809_v55 = vadd.f32 %v808_v52, %v807_v50  ;;  %v842_v50 = vsel %vm729_vm2, %v719_v41, 0.0 }
 0x130   :  { %v811_v56 = vadd.f32 %v810_v54, %v809_v55  ;;  %v844_v54 = vsel %vm729_vm2, %v720_v39, 0.0 }
 0x132   :  { %v813_v0 = vadd.f32 %v812_v60, %v811_v56  ;;  %v848_v60 = vsel %vm729_vm2, %v722_v51, 0.0 }
 0x134   :  { %v815_v2 = vadd.f32 %v814_v62, %v813_v0  ;;  %v852_v0 = vsel %vm729_vm2, %v724_v63, 0.0 }
 0x136   :  { %v817_v7 = vadd.f32 %v816_v4, %v815_v2  ;;  %v854_v2 = vsel %vm729_vm2, %v725_v14, 0.0  ;;  %v793_v4 = vrot.slane %v1632_v24, 4 }
 0x138   :  { %v819_v8 = vadd.f32 %v818_v6, %v817_v7  ;;  %v794_v7 = vadd.f32 %v793_v4, %v1632_v24 }
 0x13a   :  { %v821_v12 = vadd.f32 %v820_v9, %v819_v8  ;;  %v795_v46 = vrot.slane %v794_v7, 2 }
 0x13c   :  { %v823_v16 = vadd.f32 %v822_v10, %v821_v12  ;;  %v796_v61 = vadd.f32 %v795_v46, %v794_v7 }
 0x13e   :  { %v825_v21 = vadd.f32 %v824_v17, %v823_v16  ;;  %v797_v17 = vrot.slane %v796_v61, 1 }
 0x140   :  { %v827_v22 = vadd.f32 %v826_v19, %v825_v21  ;;  %v798_v5 = vadd.f32 %v797_v17, %v796_v61 }
 0x142   :  { %v829_v32 = vadd.f32 %v828_v23, %v827_v22 }
 0x144   :  { %v831_v33 = vadd.f32 %v830_v30, %v829_v32 }
 0x146   :  { %v833_v37 = vadd.f32 %v832_v34, %v831_v33 }
 0x148   :  { %v835_v20 = vadd.f32 %v834_v35, %v833_v37 }
 0x14a   :  { %v837_v44 = vadd.f32 %v836_v40, %v835_v20 }
 0x14c   :  { %v839_v47 = vadd.f32 %v838_v42, %v837_v44 }
 0x14e   :  { %v841_v52 = vadd.f32 %v840_v49, %v839_v47 }
 0x150   :  { %v843_v18 = vadd.f32 %v842_v50, %v841_v52 }
 0x152   :  { %v845_v55 = vadd.f32 %v844_v54, %v843_v18 }
 0x154   :  { %v847_v56 = vadd.f32 %v846_v28, %v845_v55 }
 0x156   :  { %v849_v62 = vadd.f32 %v848_v60, %v847_v56 }
 0x158   :  { %v851_v38 = vadd.f32 %v850_v27, %v849_v62 }
 0x15a   :  { %v853_v36 = vadd.f32 %v852_v0, %v851_v38 }
 0x15c   :  { %v855_v6 = vadd.f32 %v854_v2, %v853_v36 }
 0x15e   :  { %v857_v8 = vadd.f32 %v856_v26, %v855_v6 }
 0x160   :  { %v859_v9 = vadd.f32 %v858_v45, %v857_v8 }
 0x162   :  { %v861_v10 = vadd.f32 %v860_v43, %v859_v9 }
 0x164   :  { %v862_v59 = vrot.slane %v861_v10, 4 }
 0x166   :  { %v863_v12 = vadd.f32 %v862_v59, %v861_v10 }
 0x168   :  { %v864_v16 = vrot.slane %v863_v12, 2 }
 0x16a   :  { %v865_v57 = vadd.f32 %v864_v16, %v863_v12 }
 0x16c   :  { %v866_v19 = vrot.slane %v865_v57, 1 }
 0x16e   :  { %v867_v58 = vadd.f32 %v866_v19, %v865_v57 }
 0x170   :  { %v875_v21 = vsel %vm874_vm4, %v867_v58, %v798_v5 }
 0x171   :  { %1208 = vmatmul.mubr.msk.f32.vlgmr.msra.gmra.mrb[30].mxu1 %vm729_vm2, %v875_v21 }
 0x244   :  { %v944_v24 = vpop.f32.mrb[30].mxu1 }
 0x245   :  { %948 = vst [vmem:[%s1704_s3] sm:$0x3] %v944_v24  ;;  %v1209_v22 = vpop.f32.mrb[31].mxu1 }

</bundles_post_ra>
